<compile_context>
chip_gen: v7x
topology: tpu7x:2x2x1
jax: 0.10.0
libtpu: 0.0.40
codegen_flags: <defaults>
</compile_context>

<pallas_src>
import jax
import jax.numpy as jnp
import numpy as np
from jax import lax
from jax.experimental import pallas as pl
from jax.experimental.pallas import tpu as pltpu


_LANE = 128
_BASE_TILE = 256                     # base granularity for A tiles
_VMEM_LIMIT = 48 * 1024 * 1024       # safe on v5e/v6e (128 MiB) and v7x (64 MiB)
_X_RESIDENT_BYTES = 8 * 1024 * 1024  # keep X fully resident below this size


def _round_up(x, mult):
    return ((x + mult - 1) // mult) * mult


def _pick_tile(size, max_tile, gran, prefer_even=False):
    """Largest divisor of `size` that is a multiple of `gran` and <= max_tile.

    With prefer_even=True, favors tile counts that are even (>=2) so the
    'parallel' grid axis splits evenly across v7x's two TensorCores.
    """
    cands = [t for t in range(gran, size + 1, gran)
             if size % t == 0 and t <= max_tile]
    if not cands:
        return size
    if prefer_even:
        even = [t for t in cands if (size // t) % 2 == 0]
        if even:
            return max(even)
        multi = [t for t in cands if size // t >= 2]
        if multi:
            return max(multi)
    return max(cands)


# ----------------------------- Pallas kernels ------------------------------


def _make_prop_kernel(*, transpose_lhs, x_resident, has_avg, emit_raw, tk):
    """One tile of Y = (A @ X) * scale  or  Y = (A^T @ X) * scale.

    Grid is (output_row_tiles, reduction_tiles).  A arrives as int8 and is
    cast to the compute dtype in-kernel (VPU cast hides under DMA slack).
    The f32 accumulator lives in VMEM scratch; on the last reduction step the
    scaled result is emitted (optionally in a low-precision dtype) and/or the
    fused average 0.5*(scaled + avg) is stored.
    """

    def kernel(*refs):
        i = 0
        a_ref = refs[i]; i += 1
        x_ref = refs[i]; i += 1
        scale_ref = refs[i]; i += 1
        avg_ref = None
        if has_avg:
            avg_ref = refs[i]; i += 1
        raw_ref = None
        if emit_raw:
            raw_ref = refs[i]; i += 1
        avg_out_ref = None
        if has_avg:
            avg_out_ref = refs[i]; i += 1
        acc_ref = refs[i]

        k = pl.program_id(1)

        @pl.when(k == 0)
        def _init():
            acc_ref[...] = jnp.zeros_like(acc_ref)

        if x_resident:
            off = pl.multiple_of(k * tk, tk)
            x = x_ref[pl.ds(off, tk), :]
        else:
            x = x_ref[...]
        a = a_ref[...].astype(x.dtype)

        if transpose_lhs:
            # Contract over A's row axis directly -- no materialized A^T.
            acc_ref[...] += lax.dot_general(
                a, x,
                dimension_numbers=(((0,), (0,)), ((), ())),
                preferred_element_type=jnp.float32)
        else:
            acc_ref[...] += jnp.dot(a, x, preferred_element_type=jnp.float32)

        @pl.when(k == pl.num_programs(1) - 1)
        def _finalize():
            scaled = acc_ref[...] * scale_ref[...]
            if emit_raw:
                raw_ref[...] = scaled.astype(raw_ref.dtype)
            if has_avg:
                avg_out_ref[...] = (
                    0.5 * (scaled + avg_ref[...].astype(jnp.float32))
                ).astype(avg_out_ref.dtype)

    return kernel


def _score_kernel(src_ref, dst_ref, out_ref):
    """Row-wise dot products in the natural (L, d) layout (no transpose)."""
    out_ref[...] = jnp.sum(src_ref[...] * dst_ref[...], axis=1, keepdims=True)


# ------------------------------ Wrappers -----------------------------------


def _propagation_pass(adj_i8, x, scale, *, transpose_lhs, avg_with=None,
                      emit_raw=True, raw_dtype=None, avg_dtype=jnp.float32,
                      row_tile=1024, red_tile=2048):
    """Y_raw = (A @ X) * scale[:, None]       (transpose_lhs=False)
       Y_raw = (A^T @ X) * scale[:, None]     (transpose_lhs=True)
       Y_avg = 0.5 * (Y_raw + avg_with)       (if avg_with is not None)

    adj_i8 / x / scale / avg_with are padded to tile multiples; x.shape[1] is a
    multiple of 128.  Only A (int8) is streamed over the grid; X is fully
    resident when small, otherwise streamed per-k tile; scale, avg and the f32
    accumulator stay resident per output-row tile.
    """
    m, n = adj_i8.shape
    d = x.shape[1]
    out_rows, red = (n, m) if transpose_lhs else (m, n)

    tr = _pick_tile(out_rows, row_tile, _BASE_TILE, prefer_even=True)
    tk = _pick_tile(red, red_tile, _BASE_TILE)

    x_resident = red * d * x.dtype.itemsize <= _X_RESIDENT_BYTES

    if transpose_lhs:
        a_spec = pl.BlockSpec((tk, tr), lambda j, k: (k, j))
    else:
        a_spec = pl.BlockSpec((tr, tk), lambda j, k: (j, k))

    in_specs = [a_spec]
    if x_resident:
        in_specs.append(pl.BlockSpec((red, d), lambda j, k: (0, 0)))
    else:
        in_specs.append(pl.BlockSpec((tk, d), lambda j, k: (k, 0)))
    in_specs.append(pl.BlockSpec((tr, 1), lambda j, k: (j, 0)))

    operands = [adj_i8, x, scale[:, None]]
    has_avg = avg_with is not None
    if has_avg:
        in_specs.append(pl.BlockSpec((tr, d), lambda j, k: (j, 0)))
        operands.append(avg_with)

    out_shapes, out_specs = [], []
    if emit_raw:
        out_shapes.append(jax.ShapeDtypeStruct((out_rows, d),
                                               raw_dtype or x.dtype))
        out_specs.append(pl.BlockSpec((tr, d), lambda j, k: (j, 0)))
    if has_avg:
        out_shapes.append(jax.ShapeDtypeStruct((out_rows, d), avg_dtype))
        out_specs.append(pl.BlockSpec((tr, d), lambda j, k: (j, 0)))

    kernel = _make_prop_kernel(transpose_lhs=transpose_lhs,
                               x_resident=x_resident,
                               has_avg=has_avg, emit_raw=emit_raw, tk=tk)

    bytes_accessed = (
        adj_i8.size * adj_i8.dtype.itemsize
        + x.size * x.dtype.itemsize
        + out_rows * 4
        + (avg_with.size * avg_with.dtype.itemsize if has_avg else 0)
        + sum(int(np.prod(s.shape)) * np.dtype(s.dtype).itemsize
              for s in out_shapes))
    cost = pl.CostEstimate(flops=2 * out_rows * red * d, transcendentals=0,
                           bytes_accessed=int(bytes_accessed))

    single = len(out_shapes) == 1
    return pl.pallas_call(
        kernel,
        out_shape=out_shapes[0] if single else tuple(out_shapes),
        grid=(out_rows // tr, red // tk),
        in_specs=in_specs,
        out_specs=out_specs[0] if single else tuple(out_specs),
        scratch_shapes=[pltpu.VMEM((tr, d), jnp.float32)],
        compiler_params=pltpu.CompilerParams(
            dimension_semantics=("parallel", "arbitrary"),
            vmem_limit_bytes=_VMEM_LIMIT),
        cost_estimate=cost,
    )(*operands)


def lgcn_propagate(adj_i8, u0_p, inv_sqrt_user, inv_sqrt_item, *,
                   compute_dtype=jnp.bfloat16):
    """Three propagation passes on the MXU; averaging fused into finalize."""
    # E1 = (A^T @ U0) * isi, emitted directly in compute_dtype.
    e1 = _propagation_pass(adj_i8, u0_p.astype(compute_dtype), inv_sqrt_item,
                           transpose_lhs=True, emit_raw=True,
                           raw_dtype=compute_dtype)               # (n_pad, d_pad)

    # U2 = (A @ E1) * isu (compute_dtype) and U = 0.5*(U0 + U2) (f32), fused.
    u2, u = _propagation_pass(adj_i8, e1, inv_sqrt_user,
                              transpose_lhs=False, avg_with=u0_p,
                              emit_raw=True, raw_dtype=compute_dtype)

    # E = 0.5*(E1 + (A^T @ U2) * isi), fused; only the averaged result emitted.
    e = _propagation_pass(adj_i8, u2, inv_sqrt_item,
                          transpose_lhs=True, avg_with=e1,
                          emit_raw=False)
    return u, e


def edge_scores(src, dst):
    """src / dst: (L_pad, d_pad) f32 rows; returns (L_pad,) f32 dot products."""
    l_pad, d_pad = src.shape
    tl = _pick_tile(l_pad, 1024, _LANE)
    cost = pl.CostEstimate(flops=2 * l_pad * d_pad, transcendentals=0,
                           bytes_accessed=2 * l_pad * d_pad * 4 + l_pad * 4)
    out = pl.pallas_call(
        _score_kernel,
        out_shape=jax.ShapeDtypeStruct((l_pad, 1), jnp.float32),
        grid=(l_pad // tl,),
        in_specs=[
            pl.BlockSpec((tl, d_pad), lambda i: (i, 0)),
            pl.BlockSpec((tl, d_pad), lambda i: (i, 0)),
        ],
        out_specs=pl.BlockSpec((tl, 1), lambda i: (i, 0)),
        compiler_params=pltpu.CompilerParams(
            dimension_semantics=("parallel",),
            vmem_limit_bytes=_VMEM_LIMIT),
        cost_estimate=cost,
    )(src, dst)
    return out[:, 0]


def lgcn_e_forward(u0_weight, edge_index, edge_label_index=None, n_items=None,
                   normalize=False, compute_dtype=jnp.bfloat16):
    """Equivalent of LGCN_E.forward(edge_index, edge_label_index, n_items)."""
    if edge_label_index is None:
        edge_label_index = edge_index
    m, d = u0_weight.shape
    if n_items is None:
        # NOTE: forces a host sync (matches PyTorch's `.max().item() + 1`
        # fallback); pass n_items explicitly when running under jit.
        n_items = int(edge_index[1].max()) + 1

    m_pad = _round_up(m, _BASE_TILE)
    n_pad = _round_up(n_items, _BASE_TILE)
    d_pad = _round_up(d, _LANE)

    users = edge_index[0].astype(jnp.int32)
    items = edge_index[1].astype(jnp.int32)

    # Glue: dense adjacency (edge multiplicities) built directly into the
    # padded buffer, stored as int8 so only 1 byte/element is streamed.
    # TODO(synk): int8 multiplicities are exact only up to 127 per (user,item).
    adj_p = jnp.zeros((m_pad, n_pad), jnp.int32).at[users, items].add(
        1).astype(jnp.int8)

    u0_p = jnp.zeros((m_pad, d_pad), jnp.float32).at[:m, :d].set(
        u0_weight.astype(jnp.float32))

    if normalize:
        # O(num_edges) degree computation straight from edge_index -- no extra
        # reduction pass over A.  Zero-degree nodes get scale 0 (the PyTorch
        # `degree().pow(-0.5)` would produce inf there).
        user_deg = jnp.zeros((m_pad,), jnp.float32).at[users].add(1.0)
        item_deg = jnp.zeros((n_pad,), jnp.float32).at[items].add(1.0)
        inv_sqrt_user = jnp.where(user_deg > 0,
                                  lax.rsqrt(jnp.maximum(user_deg, 1.0)), 0.0)
        inv_sqrt_item = jnp.where(item_deg > 0,
                                  lax.rsqrt(jnp.maximum(item_deg, 1.0)), 0.0)
    else:
        # TODO(synk): PyTorch multiplies by an *uninitialized* torch.Tensor(1)
        # when normalize=False; we use the only sensible value, 1.0.
        inv_sqrt_user = jnp.ones((m_pad,), jnp.float32)
        inv_sqrt_item = jnp.ones((n_pad,), jnp.float32)

    u_p, e_p = lgcn_propagate(adj_p, u0_p, inv_sqrt_user, inv_sqrt_item,
                              compute_dtype=compute_dtype)

    # Glue: gather label rows (natural (L, d) layout -- no transpose).
    # TODO(synk): for very large label sets, fuse this gather into the score
    # kernel via PrefetchScalarGridSpec instead of materializing (L, d) arrays.
    l = edge_label_index.shape[1]
    l_pad = _round_up(l, _LANE)
    src_idx = jnp.zeros((l_pad,), jnp.int32).at[:l].set(
        edge_label_index[0].astype(jnp.int32))
    dst_idx = jnp.zeros((l_pad,), jnp.int32).at[:l].set(
        edge_label_index[1].astype(jnp.int32))
    src = u_p[src_idx]            # (L_pad, d_pad) f32
    dst = e_p[dst_idx]            # (L_pad, d_pad) f32
    return edge_scores(src, dst)[:l]


# ------------------------------ Reference ----------------------------------


def reference_forward(u0, edge_index, edge_label_index, n_items, normalize):
    m, d = u0.shape
    src_idx, dst_idx = edge_index[0], edge_index[1]

    def scatter(x, from_idx, to_idx, size):
        return jnp.zeros((size, d), jnp.float32).at[to_idx].add(x[from_idx])

    if normalize:
        udeg = jnp.zeros((m,), jnp.float32).at[src_idx].add(1.0)
        ideg = jnp.zeros((n_items,), jnp.float32).at[dst_idx].add(1.0)
        isu = (udeg ** -0.5)[:, None]
        isi = (ideg ** -0.5)[:, None]
    else:
        isu = jnp.float32(1.0)
        isi = jnp.float32(1.0)

    e1 = scatter(u0, src_idx, dst_idx, n_items) * isi
    u2 = scatter(e1, dst_idx, src_idx, m) * isu
    e3 = scatter(u2, src_idx, dst_idx, n_items) * isi
    e = 0.5 * (e1 + e3)
    u = 0.5 * (u0 + u2)
    return jnp.sum(u[edge_label_index[0]] * e[edge_label_index[1]], axis=-1)


# --------------------------------- Main -------------------------------------


if __name__ == "__main__":
    key = jax.random.PRNGKey(0)
    m, n_items, emb_dim = 8, 16, 32
    num_extra_edges = 24
    num_labels = 8

    k1, k2, k3, k4, k5 = jax.random.split(key, 5)

    # Deterministic "Embedding" weight (m, emb_dim), as in LGCN_E.__init__.
    u0_weight = jax.random.normal(k1, (m, emb_dim), jnp.float32)

    # Bipartite edges (user -> item); cover every user and item at least once
    # so degree^-0.5 normalization is finite.
    base_users = jnp.arange(n_items, dtype=jnp.int32) % m
    base_items = jnp.arange(n_items, dtype=jnp.int32)
    extra_users = jax.random.randint(k2, (num_extra_edges,), 0, m, jnp.int32)
    extra_items = jax.random.randint(k3, (num_extra_edges,), 0, n_items, jnp.int32)
    edge_index = jnp.stack([
        jnp.concatenate([base_users, extra_users]),
        jnp.concatenate([base_items, extra_items]),
    ])

    edge_label_index = jnp.stack([
        jax.random.randint(k4, (num_labels,), 0, m, jnp.int32),
        jax.random.randint(k5, (num_labels,), 0, n_items, jnp.int32),
    ])

    ref = reference_forward(u0_weight, edge_index, edge_label_index,
                            n_items, True)

    # f32 path: tight check of the tiled-matmul formulation (int8 A is exact).
    scores_f32 = lgcn_e_forward(u0_weight, edge_index, edge_label_index,
                                n_items=n_items, normalize=True,
                                compute_dtype=jnp.float32)
    scores_f32 = jax.block_until_ready(scores_f32)
    np.testing.assert_allclose(np.asarray(scores_f32), np.asarray(ref),
                               rtol=1e-4, atol=1e-4)

    # bf16 path (default): bf16 compute inputs, f32 accumulation.
    scores = lgcn_e_forward(u0_weight, edge_index, edge_label_index,
                            n_items=n_items, normalize=True)
    scores = jax.block_until_ready(scores)
    assert scores.shape == (num_labels,)
    np.testing.assert_allclose(np.asarray(scores), np.asarray(ref),
                               rtol=5e-2, atol=1e-1)

    print("KERNEL_OK")
</pallas_src>

<mosaic_0001>
module attributes {stable_mosaic.version = 11 : i64} {
  func.func @kernel(%arg0: i32, %arg1: i32, %arg2: memref<256x256xi8, #tpu.memory_space<vmem>>, %arg3: memref<256x128xf32, #tpu.memory_space<vmem>>, %arg4: memref<256x1xf32, #tpu.memory_space<vmem>>, %arg5: memref<256x128xf32, #tpu.memory_space<vmem>>, %arg6: memref<256x128xf32, #tpu.memory_space<vmem>>) attributes {dimension_semantics = [#tpu.dimension_semantics<parallel>, #tpu.dimension_semantics<arbitrary>], iteration_bounds = array<i64: 1, 1>, scalar_prefetch = 0 : i64, scratch_operands = 1 : i64, tpu.core_type = #tpu.core_type<tc>, window_params = [{transform_indices = @transform_0, window_bounds = array<i64: 256, 256>}, {pipeline_mode = #tpu.pipeline_mode<synchronous>, transform_indices = @transform_1, window_bounds = array<i64: 256, 128>}, {transform_indices = @transform_2, window_bounds = array<i64: 256, 1>}, {transform_indices = @transform_3, window_bounds = array<i64: 256, 128>}]} {
    %c0_i32 = arith.constant 0 : i32
    %0 = arith.cmpi eq, %arg1, %c0_i32 : i32
    %1 = arith.extui %0 : i1 to i32
    %c0_i32_0 = arith.constant 0 : i32
    %2 = arith.cmpi ne, %1, %c0_i32_0 : i32
    scf.if %2 {
      %cst_9 = arith.constant 0.000000e+00 : f32
      %16 = vector.broadcast %cst_9 : f32 to vector<256x128xf32>
      %c0_10 = arith.constant 0 : index
      %c0_11 = arith.constant 0 : index
      %17 = vector.load %arg6[%c0_10, %c0_11] : memref<256x128xf32, #tpu.memory_space<vmem>>, vector<256x128xf32>
      tpu.vector_store %arg6[%c0_10, %c0_11], %16 {strides = array<i32>} : memref<256x128xf32, #tpu.memory_space<vmem>>, vector<256x128xf32>,
    } else {
    }
    %c256_i32 = arith.constant 256 : i32
    %3 = arith.muli %arg1, %c256_i32 : i32
    %4 = tpu.assume_multiple %3, 256 : i32
    %5 = arith.index_cast %4 : i32 to index
    %c0 = arith.constant 0 : index
    %6 = vector.load %arg3[%5, %c0] : memref<256x128xf32, #tpu.memory_space<vmem>>, vector<256x128xf32>
    %c0_1 = arith.constant 0 : index
    %c0_2 = arith.constant 0 : index
    %7 = vector.load %arg2[%c0_1, %c0_2] : memref<256x256xi8, #tpu.memory_space<vmem>>, vector<256x256xi8>
    %8 = arith.sitofp %7 : vector<256x256xi8> to vector<256x256xf32>
    %c0_3 = arith.constant 0 : index
    %c0_4 = arith.constant 0 : index
    %9 = vector.load %arg6[%c0_3, %c0_4] : memref<256x128xf32, #tpu.memory_space<vmem>>, vector<256x128xf32>
    %cst = arith.constant dense<0.000000e+00> : vector<256x128xf32>
    %10 = tpu.matmul %8, %6, %cst {dimension_numbers = #tpu.dot_dimension_numbers<[0], [0], [1], [1], [0, 1, 1, 1], [], []>} : vector<256x256xf32>, vector<256x128xf32>, vector<256x128xf32> -> vector<256x128xf32>
    %11 = arith.addf %9, %10 : vector<256x128xf32>
    %c0_5 = arith.constant 0 : index
    %c0_6 = arith.constant 0 : index
    %12 = vector.load %arg6[%c0_5, %c0_6] : memref<256x128xf32, #tpu.memory_space<vmem>>, vector<256x128xf32>
    tpu.vector_store %arg6[%c0_5, %c0_6], %11 {strides = array<i32>} : memref<256x128xf32, #tpu.memory_space<vmem>>, vector<256x128xf32>,
    %c0_i32_7 = arith.constant 0 : i32
    %13 = arith.cmpi eq, %arg1, %c0_i32_7 : i32
    %14 = arith.extui %13 : i1 to i32
    %c0_i32_8 = arith.constant 0 : i32
    %15 = arith.cmpi ne, %14, %c0_i32_8 : i32
    scf.if %15 {
      %c0_9 = arith.constant 0 : index
      %c0_10 = arith.constant 0 : index
      %16 = vector.load %arg6[%c0_9, %c0_10] : memref<256x128xf32, #tpu.memory_space<vmem>>, vector<256x128xf32>
      %c0_11 = arith.constant 0 : index
      %c0_12 = arith.constant 0 : index
      %17 = vector.load %arg4[%c0_11, %c0_12] : memref<256x1xf32, #tpu.memory_space<vmem>>, vector<256x1xf32>
      %18 = vector.broadcast %17 : vector<256x1xf32> to vector<256x128xf32>
      %19 = arith.mulf %16, %18 : vector<256x128xf32>
      %c0_13 = arith.constant 0 : index
      %c0_14 = arith.constant 0 : index
      %20 = vector.load %arg5[%c0_13, %c0_14] : memref<256x128xf32, #tpu.memory_space<vmem>>, vector<256x128xf32>
      tpu.vector_store %arg5[%c0_13, %c0_14], %19 {strides = array<i32>} : memref<256x128xf32, #tpu.memory_space<vmem>>, vector<256x128xf32>,
    } else {
    }
    return
  }
  func.func @transform_0(%arg0: i32, %arg1: i32) -> (i32, i32) {
    %c0_i32 = arith.constant 0 : i32
    return %arg1, %arg0 : i32, i32
  }
  func.func @transform_1(%arg0: i32, %arg1: i32) -> (i32, i32) {
    %c0_i32 = arith.constant 0 : i32
    %c0_i32_0 = arith.constant 0 : i32
    %c0_i32_1 = arith.constant 0 : i32
    return %c0_i32, %c0_i32_0 : i32, i32
  }
  func.func @transform_2(%arg0: i32, %arg1: i32) -> (i32, i32) {
    %c0_i32 = arith.constant 0 : i32
    %c0_i32_0 = arith.constant 0 : i32
    return %arg0, %c0_i32 : i32, i32
  }
  func.func @transform_3(%arg0: i32, %arg1: i32) -> (i32, i32) {
    %c0_i32 = arith.constant 0 : i32
    %c0_i32_0 = arith.constant 0 : i32
    return %arg0, %c0_i32 : i32, i32
  }
}

</mosaic_0001>

<bundles_post_ra>
// kernel: tpu_custom_call.1
= control target key start
LH: loop header
LB: loop body
LE: loop exit
PB: predicated region body
PF: predicated region fallthrough
CT: control target
= control target key end

     0   :  { %8 = vsyncpa [#allocation4], 0  ;;  %s1716_s0 = inlined_call_operand.hbm [shape: s8[256,256], index: 0, kind: input, shape index: {}]   ;;  %s1717_s1 = inlined_call_operand.vmem [shape: f32[256,128], index: 1, kind: input, shape index: {}]   ;;  %s1718_s2 = inlined_call_operand.vmem [shape: f32[256,1], index: 2, kind: input, shape index: {}]   ;;  %s1719_s3 = inlined_call_operand.hbm [shape: f32[256,128], index: 3, kind: output, shape index: {}]  }
   0x1   :  { %9 = vsyncpa [#allocation5], 0  ;;  %s1362_s12 = smov [#allocation3]   ;;  %s1314_s16 = scalar_lea.hbm %s1716_s0, 2048 }
   0x2   :  { %s15_s13 = sshll.u32 %s1362_s12, 4  ;;  %p1315_p0 = scmp.ne.s32.totalorder %s1716_s0, %s1314_s16  ;;  %s16_s13 = int_to_ptr.vmem [resolvable:$true] %s15_s13 }
   0x3   :  { %p1318_p1 = scmp.lt.u32.totalorder %s1314_s16, %s1716_s0 }
   0x5   :  { %p1320_p2 = pnand %p1318_p1, %p1315_p0 }
   0x7   :  { %1323 = shalt.err (!%p1320_p2)
}
   0x8   :  { %s1324_s21 = scalar_lea.vmem %s16_s13, 2048  ;;  %p1329_p4 = scmp.lt.s32.totalorder %s16_s13, %s16_s13 }
   0x9   :  { %p1325_p3 = scmp.ne.s32.totalorder %s16_s13, %s1324_s21  ;;  %p1330_p5 = scmp.lt.s32.totalorder %s1324_s21, %s1324_s21 }
   0xb   :  { %p1331_p6 = por %p1330_p5, %p1329_p4 }
   0xd   :  { %p1332_p7 = pnand %p1331_p6, %p1325_p3 }
   0xf   :  { %1335 = shalt.err (!%p1332_p7)
}
  0x10   :  { %s1363_s22 = smov 256   ;;  %s1364_s23 = smov 16  }
  0x11   :  { %21 = dma.hbm_to_vmem [thread:$0]  %s1716_s0, 2048, %s16_s13, [#allocation4], %s1363_s22, %s1363_s22, %s1364_s23  }
  0x12   :  { %1358 = dma.done.wait [#allocation4], 2048  }
  0x13   :  { %1359 = vsyncadd [#allocation4], 4294965248  ;;  %v1365_v0 = vmov 0.0|0.0   ;;  %v107_v1 = vld [vmem:[#allocation3 + $0x40] sm:$0xff]  ;;  %v108_v2 = vld [vmem:[#allocation3 + $0x48] sm:$0xff] }
  0x14   :  { %1000 = vmatprep.subr.bf16.mxu0 %v1365_v0  ;;  %1048 = vmatprep.subr.bf16.mxu1 %v1365_v0  ;;  %v99_v3 = vld [vmem:[#allocation3] sm:$0xff]  ;;  %v147_v4 = vunpack.c.0.s8 %v107_v1  ;;  %v148_v5 = vunpack.c.0.s8 %v108_v2  ;;  %v100_v6 = vld [vmem:[#allocation3 + $0x8] sm:$0xff]  ;;  %v149_v8 = vunpack.c.1.s8 %v107_v1  ;;  %v150_v10 = vunpack.c.1.s8 %v108_v2  ;;  %v109_v33 = vld [vmem:[#allocation3 + $0x50] sm:$0xff] }
  0x15   :  { %v115_v7 = vunpack.c.0.s8 %v99_v3  ;;  %v116_v9 = vunpack.c.0.s8 %v100_v6  ;;  %v117_v11 = vunpack.c.1.s8 %v99_v3  ;;  %v118_v12 = vunpack.c.1.s8 %v100_v6  ;;  %v110_v34 = vld [vmem:[#allocation3 + $0x58] sm:$0xff]  ;;  %v101_v39 = vld [vmem:[#allocation3 + $0x10] sm:$0xff] }
  0x16   :  { %v211_v13 = vcvt.s32.f32 %v147_v4  ;;  %v212_v14 = vcvt.s32.f32 %v148_v5  ;;  %v213_v16 = vcvt.s32.f32 %v149_v8  ;;  %v214_v18 = vcvt.s32.f32 %v150_v10  ;;  %v102_v40 = vld [vmem:[#allocation3 + $0x18] sm:$0xff] }
  0x17   :  { %v179_v15 = vcvt.s32.f32 %v115_v7  ;;  %v180_v17 = vcvt.s32.f32 %v116_v9  ;;  %v181_v19 = vcvt.s32.f32 %v117_v11  ;;  %v182_v20 = vcvt.s32.f32 %v118_v12 }
  0x18   :  { %v1088_v21 = vpack.i.bf16 %v212_v14, %v211_v13  ;;  %v151_v22 = vunpack.c.2.s8 %v107_v1  ;;  %v152_v23 = vunpack.c.2.s8 %v108_v2  ;;  %v119_v24 = vunpack.c.2.s8 %v99_v3 }
  0x19   :  { %v1200_v25 = vpack.i.bf16 %v180_v17, %v179_v15  ;;  %v1090_v26 = vpack.i.bf16 %v214_v18, %v213_v16  ;;  %v1202_v27 = vpack.i.bf16 %v182_v20, %v181_v19  ;;  %v120_v28 = vunpack.c.2.s8 %v100_v6  ;;  %v1404_v18 = vld [vmem:[#allocation3 + $0x60] sm:$0xff]  ;;  %v1406_v19 = vld [vmem:[#allocation3 + $0x68] sm:$0xff] }
  0x1a   :  { %1089 = vxpose.xlu0.b32.start [1/16] %v1088_v21, 128  ;;  %v215_v29 = vcvt.s32.f32 %v151_v22  ;;  %v216_v30 = vcvt.s32.f32 %v152_v23  ;;  %v183_v31 = vcvt.s32.f32 %v119_v24  ;;  %v153_v32 = vunpack.c.3.s8 %v107_v1  ;;  %v1408_v20 = vld [vmem:[#allocation3 + $0x20] sm:$0xff]  ;;  %v1410_v21 = vld [vmem:[#allocation3 + $0x28] sm:$0xff] }
  0x1b   :  { %1201 = vxpose.xlu1.b32.start [1/16] %v1200_v25, 128  ;;  %v184_v35 = vcvt.s32.f32 %v120_v28  ;;  %v154_v36 = vunpack.c.3.s8 %v108_v2  ;;  %v121_v37 = vunpack.c.3.s8 %v99_v3  ;;  %v122_v38 = vunpack.c.3.s8 %v100_v6 }
  0x1c   :  { %v217_v41 = vcvt.s32.f32 %v153_v32  ;;  %v155_v43 = vunpack.c.0.s8 %v109_v33  ;;  %v156_v44 = vunpack.c.0.s8 %v110_v34  ;;  %v1092_v45 = vpack.i.bf16 %v216_v30, %v215_v29 }
  0x1d   :  { %v218_v42 = vcvt.s32.f32 %v154_v36  ;;  %v123_v46 = vunpack.c.0.s8 %v101_v39  ;;  %v124_v47 = vunpack.c.0.s8 %v102_v40  ;;  %v1204_v48 = vpack.i.bf16 %v184_v35, %v183_v31 }
  0x1e   :  { %1091 = vxpose.xlu0.b32.cont [2/16] %v1090_v26, 128  ;;  %v185_v49 = vcvt.s32.f32 %v121_v37  ;;  %v186_v50 = vcvt.s32.f32 %v122_v38  ;;  %v219_v52 = vcvt.s32.f32 %v155_v43  ;;  %v220_v53 = vcvt.s32.f32 %v156_v44 }
  0x1f   :  { %1203 = vxpose.xlu1.b32.cont [2/16] %v1202_v27, 128  ;;  %v1094_v51 = vpack.i.bf16 %v218_v42, %v217_v41  ;;  %v187_v54 = vcvt.s32.f32 %v123_v46  ;;  %v188_v55 = vcvt.s32.f32 %v124_v47  ;;  %v157_v56 = vunpack.c.1.s8 %v109_v33 }
  0x20   :  { %v158_v57 = vunpack.c.1.s8 %v110_v34  ;;  %v1206_v58 = vpack.i.bf16 %v186_v50, %v185_v49  ;;  %v125_v59 = vunpack.c.1.s8 %v101_v39  ;;  %v126_v60 = vunpack.c.1.s8 %v102_v40 }
  0x21   :  { %v159_v61 = vunpack.c.2.s8 %v109_v33  ;;  %v160_v62 = vunpack.c.2.s8 %v110_v34  ;;  %v1096_v63 = vpack.i.bf16 %v220_v53, %v219_v52  ;;  %v1208_v1 = vpack.i.bf16 %v188_v55, %v187_v54  ;;  %v67_v52 = vld [vmem:[%s1717_s1] sm:$0xff]  ;;  %v68_v53 = vld [vmem:[%s1717_s1 + $0x8] sm:$0xff] }
  0x22   :  { %1093 = vxpose.xlu0.b32.cont [3/16] %v1092_v45, 128  ;;  %v221_v2 = vcvt.s32.f32 %v157_v56  ;;  %v222_v3 = vcvt.s32.f32 %v158_v57  ;;  %v189_v4 = vcvt.s32.f32 %v125_v59  ;;  %v190_v5 = vcvt.s32.f32 %v126_v60  ;;  %v70_v59 = vld [vmem:[%s1717_s1 + $0x18] sm:$0xff] }
  0x23   :  { %1205 = vxpose.xlu1.b32.cont [3/16] %v1204_v48, 128  ;;  %v127_v6 = vunpack.c.2.s8 %v101_v39  ;;  %v128_v7 = vunpack.c.2.s8 %v102_v40  ;;  %v223_v8 = vcvt.s32.f32 %v159_v61  ;;  %v224_v9 = vcvt.s32.f32 %v160_v62 }
  0x24   :  { %v161_v10 = vunpack.c.3.s8 %v109_v33  ;;  %v162_v11 = vunpack.c.3.s8 %v110_v34  ;;  %v1098_v12 = vpack.i.bf16 %v222_v3, %v221_v2  ;;  %v129_v13 = vunpack.c.3.s8 %v101_v39 }
  0x25   :  { %v130_v14 = vunpack.c.3.s8 %v102_v40  ;;  %v1210_v15 = vpack.i.bf16 %v190_v5, %v189_v4  ;;  %v191_v16 = vcvt.s32.f32 %v127_v6  ;;  %v192_v17 = vcvt.s32.f32 %v128_v7  ;;  %v1440_v4 = vld [vmem:[#allocation3 + $0x70] sm:$0xff]  ;;  %v1442_v5 = vld [vmem:[#allocation3 + $0x78] sm:$0xff] }
  0x26   :  { %1095 = vxpose.xlu0.b32.cont [4/16] %v1094_v51, 128  ;;  %v1100_v22 = vpack.i.bf16 %v224_v9, %v223_v8  ;;  %v225_v23 = vcvt.s32.f32 %v161_v10  ;;  %v226_v24 = vcvt.s32.f32 %v162_v11  ;;  %v193_v25 = vcvt.s32.f32 %v129_v13  ;;  %v1444_v6 = vld [vmem:[#allocation3 + $0x30] sm:$0xff]  ;;  %v1446_v7 = vld [vmem:[#allocation3 + $0x38] sm:$0xff]  ;;  %v71_v11 = vld [vmem:[%s1717_s1 + $0x20] sm:$0xff] }
  0x27   :  { %1207 = vxpose.xlu1.b32.cont [4/16] %v1206_v58, 128  ;;  %v194_v26 = vcvt.s32.f32 %v130_v14  ;;  %v163_v27 = vunpack.c.0.s8 %v1404_v18  ;;  %v164_v28 = vunpack.c.0.s8 %v1406_v19  ;;  %v1212_v29 = vpack.i.bf16 %v192_v17, %v191_v16  ;;  %v69_v58 = vld [vmem:[%s1717_s1 + $0x10] sm:$0xff] }
  0x28   :  { %v131_v30 = vunpack.c.0.s8 %v1408_v20  ;;  %v132_v31 = vunpack.c.0.s8 %v1410_v21  ;;  %v165_v32 = vunpack.c.1.s8 %v1404_v18  ;;  %v166_v33 = vunpack.c.1.s8 %v1406_v19 }
  0x29   :  { %v1102_v34 = vpack.i.bf16 %v226_v24, %v225_v23  ;;  %v1214_v35 = vpack.i.bf16 %v194_v26, %v193_v25  ;;  %v227_v36 = vcvt.s32.f32 %v163_v27  ;;  %v228_v37 = vcvt.s32.f32 %v164_v28  ;;  %v73_v25 = vld [vmem:[%s1717_s1 + $0x30] sm:$0xff]  ;;  %v74_v26 = vld [vmem:[%s1717_s1 + $0x38] sm:$0xff] }
  0x2a   :  { %1097 = vxpose.xlu0.b32.cont [5/16] %v1096_v63, 128  ;;  %v195_v38 = vcvt.s32.f32 %v131_v30  ;;  %v196_v39 = vcvt.s32.f32 %v132_v31  ;;  %v133_v40 = vunpack.c.1.s8 %v1408_v20  ;;  %v134_v41 = vunpack.c.1.s8 %v1410_v21 }
  0x2b   :  { %1209 = vxpose.xlu1.b32.cont [5/16] %v1208_v1, 128  ;;  %v229_v42 = vcvt.s32.f32 %v165_v32  ;;  %v230_v43 = vcvt.s32.f32 %v166_v33  ;;  %v167_v44 = vunpack.c.2.s8 %v1404_v18  ;;  %v1104_v45 = vpack.i.bf16 %v228_v37, %v227_v36 }
  0x2c   :  { %v168_v46 = vunpack.c.2.s8 %v1406_v19  ;;  %v135_v47 = vunpack.c.2.s8 %v1408_v20  ;;  %v136_v48 = vunpack.c.2.s8 %v1410_v21  ;;  %v1216_v49 = vpack.i.bf16 %v196_v39, %v195_v38  ;;  %v75_v38 = vld [vmem:[%s1717_s1 + $0x40] sm:$0xff]  ;;  %v76_v39 = vld [vmem:[%s1717_s1 + $0x48] sm:$0xff] }
  0x2d   :  { %v197_v50 = vcvt.s32.f32 %v133_v40  ;;  %v198_v51 = vcvt.s32.f32 %v134_v41  ;;  %v1106_v54 = vpack.i.bf16 %v230_v43, %v229_v42  ;;  %v231_v55 = vcvt.s32.f32 %v167_v44 }
  0x2e   :  { %1099 = vxpose.xlu0.b32.cont [6/16] %v1098_v12, 128  ;;  %v169_v56 = vunpack.c.3.s8 %v1404_v18  ;;  %v170_v57 = vunpack.c.3.s8 %v1406_v19  ;;  %v232_v60 = vcvt.s32.f32 %v168_v46  ;;  %v199_v61 = vcvt.s32.f32 %v135_v47  ;;  %v72_v12 = vld [vmem:[%s1717_s1 + $0x28] sm:$0xff] }
  0x2f   :  { %1211 = vxpose.xlu1.b32.cont [6/16] %v1210_v15, 128  ;;  %v200_v62 = vcvt.s32.f32 %v136_v48  ;;  %v1001_v63 = vpack.c.bf16 %v68_v53, %v67_v52  ;;  %v1218_v1 = vpack.i.bf16 %v198_v51, %v197_v50  ;;  %v137_v2 = vunpack.c.3.s8 %v1408_v20  ;;  %v77_v50 = vld [vmem:[%s1717_s1 + $0x50] sm:$0xff]  ;;  %v78_v51 = vld [vmem:[%s1717_s1 + $0x58] sm:$0xff] }
  0x30   :  { %v138_v3 = vunpack.c.3.s8 %v1410_v21  ;;  %v1004_v8 = vpack.c.bf16 %v70_v59, %v69_v58  ;;  %v233_v9 = vcvt.s32.f32 %v169_v56  ;;  %v234_v10 = vcvt.s32.f32 %v170_v57 }
  0x31   :  { %1002 = vmatpush1.bf16.msra.mxu0 %v1001_v63  ;;  %1064 = vmatpush1.bf16.msra.mxu1 %v1001_v63  ;;  %v1108_v13 = vpack.i.bf16 %v232_v60, %v231_v55  ;;  %v1220_v14 = vpack.i.bf16 %v200_v62, %v199_v61  ;;  %v171_v15 = vunpack.c.0.s8 %v1440_v4  ;;  %v172_v16 = vunpack.c.0.s8 %v1442_v5  ;;  %v79_v61 = vld [vmem:[%s1717_s1 + $0x60] sm:$0xff]  ;;  %v80_v62 = vld [vmem:[%s1717_s1 + $0x68] sm:$0xff] }
  0x32   :  { %1101 = vxpose.xlu0.b32.cont [7/16] %v1100_v22, 128  ;;  %1003 = vmatprep.subr.bf16.mxu0 %v1365_v0  ;;  %v201_v17 = vcvt.s32.f32 %v137_v2  ;;  %v202_v18 = vcvt.s32.f32 %v138_v3  ;;  %v139_v19 = vunpack.c.0.s8 %v1444_v6  ;;  %v140_v20 = vunpack.c.0.s8 %v1446_v7 }
  0x33   :  { %1213 = vxpose.xlu1.b32.cont [7/16] %v1212_v29, 128  ;;  %1049 = vmatprep.subr.bf16.mxu1 %v1365_v0  ;;  %v1007_v21 = vpack.c.bf16 %v72_v12, %v71_v11  ;;  %v1110_v22 = vpack.i.bf16 %v234_v10, %v233_v9  ;;  %v173_v23 = vunpack.c.1.s8 %v1440_v4  ;;  %v174_v24 = vunpack.c.1.s8 %v1442_v5  ;;  %v83_v12 = vld [vmem:[%s1717_s1 + $0x80] sm:$0xff] }
  0x34   :  { %v235_v27 = vcvt.s32.f32 %v171_v15  ;;  %v236_v28 = vcvt.s32.f32 %v172_v16  ;;  %v141_v29 = vunpack.c.1.s8 %v1444_v6  ;;  %v142_v30 = vunpack.c.1.s8 %v1446_v7  ;;  %v85_v15 = vld [vmem:[%s1717_s1 + $0x90] sm:$0xff]  ;;  %v86_v16 = vld [vmem:[%s1717_s1 + $0x98] sm:$0xff] }
  0x35   :  { %1005 = vmatpush1.bf16.msra.mxu0 %v1004_v8  ;;  %1065 = vmatpush1.bf16.msra.mxu1 %v1004_v8  ;;  %v1222_v31 = vpack.i.bf16 %v202_v18, %v201_v17  ;;  %v203_v32 = vcvt.s32.f32 %v139_v19  ;;  %v204_v33 = vcvt.s32.f32 %v140_v20  ;;  %v238_v36 = vcvt.s32.f32 %v174_v24  ;;  %v82_v8 = vld [vmem:[%s1717_s1 + $0x78] sm:$0xff]  ;;  %v87_v18 = vld [vmem:[%s1717_s1 + $0xa0] sm:$0xff]  ;;  %v88_v19 = vld [vmem:[%s1717_s1 + $0xa8] sm:$0xff] }
  0x36   :  { %1103 = vxpose.xlu0.b32.cont [8/16] %v1102_v34, 128  ;;  %1006 = vmatprep.subr.bf16.mxu0 %v1365_v0  ;;  %v1010_v34 = vpack.c.bf16 %v74_v26, %v73_v25  ;;  %v175_v37 = vunpack.c.2.s8 %v1440_v4  ;;  %v1112_v40 = vpack.i.bf16 %v236_v28, %v235_v27  ;;  %v205_v41 = vcvt.s32.f32 %v141_v29  ;;  %v91_v24 = vld [vmem:[%s1717_s1 + $0xc0] sm:$0xff]  ;;  %v92_v25 = vld [vmem:[%s1717_s1 + $0xc8] sm:$0xff]  ;;  %v93_v27 = vld [vmem:[%s1717_s1 + $0xd0] sm:$0xff] }
  0x37   :  { %1215 = vxpose.xlu1.b32.cont [8/16] %v1214_v35, 128  ;;  %1050 = vmatprep.subr.bf16.mxu1 %v1365_v0  ;;  %v237_v35 = vcvt.s32.f32 %v173_v23  ;;  %v206_v42 = vcvt.s32.f32 %v142_v30  ;;  %v176_v43 = vunpack.c.2.s8 %v1442_v5  ;;  %v1224_v44 = vpack.i.bf16 %v204_v33, %v203_v32  ;;  %v94_v28 = vld [vmem:[%s1717_s1 + $0xd8] sm:$0xff]  ;;  %v95_v30 = vld [vmem:[%s1717_s1 + $0xe0] sm:$0xff]  ;;  %v97_v33 = vld [vmem:[%s1717_s1 + $0xf0] sm:$0xff] }
  0x38   :  { %v144_v46 = vunpack.c.2.s8 %v1446_v7  ;;  %v1013_v47 = vpack.c.bf16 %v76_v39, %v75_v38  ;;  %v178_v55 = vunpack.c.3.s8 %v1442_v5  ;;  %v145_v58 = vunpack.c.3.s8 %v1444_v6  ;;  %v729_v38 = vld [vmem:[%s1718_s2 + $0x10] sm:$0xff]  ;;  %v730_v39 = vld [vmem:[%s1718_s2 + $0x18] sm:$0xff] }
  0x39   :  { %1008 = vmatpush1.bf16.msra.mxu0 %v1007_v21  ;;  %1066 = vmatpush1.bf16.msra.mxu1 %v1007_v21  ;;  %v1114_v48 = vpack.i.bf16 %v238_v36, %v237_v35  ;;  %v1226_v52 = vpack.i.bf16 %v206_v42, %v205_v41  ;;  %v240_v53 = vcvt.s32.f32 %v176_v43  ;;  %v146_v59 = vunpack.c.3.s8 %v1446_v7  ;;  %v81_v7 = vld [vmem:[%s1717_s1 + $0x70] sm:$0xff]  ;;  %v728_v36 = vld [vmem:[%s1718_s2 + $0x8] sm:$0xff]  ;;  %v734_v43 = vld [vmem:[%s1718_s2 + $0x38] sm:$0xff] }
  0x3a   :  { %1105 = vxpose.xlu0.b32.cont [9/16] %v1104_v45, 128  ;;  %1009 = vmatprep.subr.bf16.mxu0 %v1365_v0  ;;  %v143_v45 = vunpack.c.2.s8 %v1444_v6  ;;  %v208_v57 = vcvt.s32.f32 %v144_v46  ;;  %v1016_v60 = vpack.c.bf16 %v78_v51, %v77_v50  ;;  %v242_v2 = vcvt.s32.f32 %v178_v55  ;;  %v89_v21 = vld [vmem:[%s1717_s1 + $0xb0] sm:$0xff]  ;;  %v732_v41 = vld [vmem:[%s1718_s2 + $0x28] sm:$0xff]  ;;  %v742_v51 = vld [vmem:[%s1718_s2 + $0x78] sm:$0xff] }
  0x3b   :  { %1217 = vxpose.xlu1.b32.cont [9/16] %v1216_v49, 128  ;;  %1051 = vmatprep.subr.bf16.mxu1 %v1365_v0  ;;  %v239_v49 = vcvt.s32.f32 %v175_v37  ;;  %v210_v5 = vcvt.s32.f32 %v146_v59  ;;  %v1019_v6 = vpack.c.bf16 %v80_v62, %v79_v61  ;;  %v1022_v11 = vpack.c.bf16 %v82_v8, %v81_v7  ;;  %v733_v42 = vld [vmem:[%s1718_s2 + $0x30] sm:$0xff]  ;;  %v746_v61 = vld [vmem:[%s1718_s2 + $0x98] sm:$0xff] }
  0x3c   :  { %v207_v56 = vcvt.s32.f32 %v143_v45  ;;  %v1028_v17 = vpack.c.bf16 %v86_v16, %v85_v15  ;;  %v1031_v20 = vpack.c.bf16 %v88_v19, %v87_v18  ;;  %v1037_v26 = vpack.c.bf16 %v92_v25, %v91_v24  ;;  %v736_v45 = vld [vmem:[%s1718_s2 + $0x48] sm:$0xff]  ;;  %v737_v46 = vld [vmem:[%s1718_s2 + $0x50] sm:$0xff] }
  0x3d   :  { %1011 = vmatpush1.bf16.msra.mxu0 %v1010_v34  ;;  %1067 = vmatpush1.bf16.msra.mxu1 %v1010_v34  ;;  %v1116_v63 = vpack.i.bf16 %v240_v53, %v239_v49  ;;  %v1040_v29 = vpack.c.bf16 %v94_v28, %v93_v27  ;;  %v98_v34 = vld [vmem:[%s1717_s1 + $0xf8] sm:$0xff]  ;;  %v1366_v37 = vmov 0   ;;  %v740_v49 = vld [vmem:[%s1718_s2 + $0x68] sm:$0xff]  ;;  %v741_v50 = vld [vmem:[%s1718_s2 + $0x70] sm:$0xff] }
  0x3e   :  { %1107 = vxpose.xlu0.b32.cont [10/16] %v1106_v54, 128  ;;  %1012 = vmatprep.subr.bf16.mxu0 %v1365_v0  ;;  %v177_v54 = vunpack.c.3.s8 %v1440_v4  ;;  %v1228_v3 = vpack.i.bf16 %v208_v57, %v207_v56  ;;  %v209_v4 = vcvt.s32.f32 %v145_v58  ;;  %v1046_v35 = vpack.c.bf16 %v98_v34, %v97_v33  ;;  %v744_v53 = vld [vmem:[%s1718_s2 + $0x88] sm:$0xff] }
  0x3f   :  { %1219 = vxpose.xlu1.b32.cont [10/16] %v1218_v1, 128  ;;  %1052 = vmatprep.subr.bf16.mxu1 %v1365_v0 }
  0x40   :  { %v241_v1 = vcvt.s32.f32 %v177_v54  ;;  %v1230_v10 = vpack.i.bf16 %v210_v5, %v209_v4  ;;  %v747_v5 = vld [vmem:[%s1718_s2 + $0xa0] sm:$0xff] }
  0x41   :  { %1014 = vmatpush1.bf16.msra.mxu0 %v1013_v47  ;;  %1068 = vmatpush1.bf16.msra.mxu1 %v1013_v47  ;;  %v738_v47 = vld [vmem:[%s1718_s2 + $0x58] sm:$0xff] }
  0x42   :  { %1109 = vxpose.xlu0.b32.cont [11/16] %v1108_v13, 128  ;;  %1015 = vmatprep.subr.bf16.mxu0 %v1365_v0  ;;  %v1118_v9 = vpack.i.bf16 %v242_v2, %v241_v1  ;;  %v84_v13 = vld [vmem:[%s1717_s1 + $0x88] sm:$0xff] }
  0x43   :  { %1221 = vxpose.xlu1.b32.cont [11/16] %v1220_v14, 128  ;;  %1053 = vmatprep.subr.bf16.mxu1 %v1365_v0  ;;  %v1025_v14 = vpack.c.bf16 %v84_v13, %v83_v12  ;;  %v749_v13 = vld [vmem:[%s1718_s2 + $0xb0] sm:$0xff] }
  0x45   :  { %1017 = vmatpush1.bf16.msra.mxu0 %v1016_v60  ;;  %1069 = vmatpush1.bf16.msra.mxu1 %v1016_v60  ;;  %v745_v60 = vld [vmem:[%s1718_s2 + $0x90] sm:$0xff] }
  0x46   :  { %1111 = vxpose.xlu0.b32.cont [12/16] %v1110_v22, 128  ;;  %1018 = vmatprep.subr.bf16.mxu0 %v1365_v0  ;;  %v90_v22 = vld [vmem:[%s1717_s1 + $0xb8] sm:$0xff] }
  0x47   :  { %1223 = vxpose.xlu1.b32.cont [12/16] %v1222_v31, 128  ;;  %1054 = vmatprep.subr.bf16.mxu1 %v1365_v0  ;;  %v1034_v23 = vpack.c.bf16 %v90_v22, %v89_v21  ;;  %v96_v31 = vld [vmem:[%s1717_s1 + $0xe8] sm:$0xff]  ;;  %v751_v21 = vld [vmem:[%s1718_s2 + $0xc0] sm:$0xff] }
  0x48   :  { %v1043_v32 = vpack.c.bf16 %v96_v31, %v95_v30  ;;  %v752_v22 = vld [vmem:[%s1718_s2 + $0xc8] sm:$0xff]  ;;  %v754_v30 = vld [vmem:[%s1718_s2 + $0xd8] sm:$0xff] }
  0x49   :  { %1020 = vmatpush1.bf16.msra.mxu0 %v1019_v6  ;;  %1070 = vmatpush1.bf16.msra.mxu1 %v1019_v6  ;;  %v748_v6 = vld [vmem:[%s1718_s2 + $0xa8] sm:$0xff] }
  0x4a   :  { %1113 = vxpose.xlu0.b32.cont [13/16] %v1112_v40, 128  ;;  %1021 = vmatprep.subr.bf16.mxu0 %v1365_v0  ;;  %v727_v40 = vld [vmem:[%s1718_s2] sm:$0xff] }
  0x4b   :  { %1225 = vxpose.xlu1.b32.cont [13/16] %v1224_v44, 128  ;;  %1055 = vmatprep.subr.bf16.mxu1 %v1365_v0  ;;  %v735_v44 = vld [vmem:[%s1718_s2 + $0x40] sm:$0xff] }
  0x4d   :  { %1023 = vmatpush1.bf16.msra.mxu0 %v1022_v11  ;;  %1071 = vmatpush1.bf16.msra.mxu1 %v1022_v11 }
  0x4e   :  { %1115 = vxpose.xlu0.b32.cont [14/16] %v1114_v48, 128  ;;  %1024 = vmatprep.subr.bf16.mxu0 %v1365_v0  ;;  %v739_v48 = vld [vmem:[%s1718_s2 + $0x60] sm:$0xff] }
  0x4f   :  { %1227 = vxpose.xlu1.b32.cont [14/16] %v1226_v52, 128  ;;  %1056 = vmatprep.subr.bf16.mxu1 %v1365_v0  ;;  %v743_v52 = vld [vmem:[%s1718_s2 + $0x80] sm:$0xff] }
  0x51   :  { %1026 = vmatpush1.bf16.msra.mxu0 %v1025_v14  ;;  %1072 = vmatpush1.bf16.msra.mxu1 %v1025_v14  ;;  %v750_v14 = vld [vmem:[%s1718_s2 + $0xb8] sm:$0xff] }
  0x52   :  { %1117 = vxpose.xlu0.b32.cont [15/16] %v1116_v63, 128  ;;  %1027 = vmatprep.subr.bf16.mxu0 %v1365_v0 }
  0x53   :  { %1229 = vxpose.xlu1.b32.cont [15/16] %v1228_v3, 128  ;;  %1057 = vmatprep.subr.bf16.mxu1 %v1365_v0 }
  0x55   :  { %1029 = vmatpush1.bf16.msra.mxu0 %v1028_v17  ;;  %1073 = vmatpush1.bf16.msra.mxu1 %v1028_v17 }
  0x56   :  { %1119 = vxpose.xlu0.b32.end [16/16] %v1118_v9, 128  ;;  %1030 = vmatprep.subr.bf16.mxu0 %v1365_v0 }
  0x57   :  { %1231 = vxpose.xlu1.b32.end [16/16] %v1230_v10, 128  ;;  %1058 = vmatprep.subr.bf16.mxu1 %v1365_v0 }
  0x59   :  { %1032 = vmatpush1.bf16.msra.mxu0 %v1031_v20  ;;  %1074 = vmatpush1.bf16.msra.mxu1 %v1031_v20 }
  0x5a   :  { %1033 = vmatprep.subr.bf16.mxu0 %v1365_v0  ;;  %1059 = vmatprep.subr.bf16.mxu1 %v1365_v0 }
  0x5d   :  { %1035 = vmatpush1.bf16.msra.mxu0 %v1034_v23  ;;  %1075 = vmatpush1.bf16.msra.mxu1 %v1034_v23 }
  0x5e   :  { %1036 = vmatprep.subr.bf16.mxu0 %v1365_v0  ;;  %1060 = vmatprep.subr.bf16.mxu1 %v1365_v0 }
  0x61   :  { %1038 = vmatpush1.bf16.msra.mxu0 %v1037_v26  ;;  %1076 = vmatpush1.bf16.msra.mxu1 %v1037_v26 }
  0x62   :  { %1039 = vmatprep.subr.bf16.mxu0 %v1365_v0  ;;  %1061 = vmatprep.subr.bf16.mxu1 %v1365_v0 }
  0x65   :  { %1041 = vmatpush1.bf16.msra.mxu0 %v1040_v29  ;;  %1077 = vmatpush1.bf16.msra.mxu1 %v1040_v29  ;;  %v753_v29 = vld [vmem:[%s1718_s2 + $0xd0] sm:$0xff] }
  0x66   :  { %1042 = vmatprep.subr.bf16.mxu0 %v1365_v0  ;;  %1062 = vmatprep.subr.bf16.mxu1 %v1365_v0 }
  0x69   :  { %1044 = vmatpush1.bf16.msra.mxu0 %v1043_v32  ;;  %1078 = vmatpush1.bf16.msra.mxu1 %v1043_v32 }
  0x6a   :  { %1045 = vmatprep.subr.bf16.mxu0 %v1365_v0  ;;  %1063 = vmatprep.subr.bf16.mxu1 %v1365_v0  ;;  %v731_v0 = vld [vmem:[%s1718_s2 + $0x20] sm:$0xff] }
  0x6d   :  { %1047 = vmatpush1.bf16.msra.mxu0 %v1046_v35  ;;  %1079 = vmatpush1.bf16.msra.mxu1 %v1046_v35 }
  0x75   :  { %1313 = vset.pattern.permute.xlu1 %v1366_v37 }
  0x76   :  { %766 = vperm.xlu1 %1313, %v728_v36  }
  0x7a   :  { %771 = vperm.xlu1 %1313, %v729_v38   ;;  %v756_v38 = vld [vmem:[%s1718_s2 + $0xe8] sm:$0xff] }
  0x7e   :  { %776 = vperm.xlu1 %1313, %v730_v39  }
  0x7f   :  { %1312 = vset.pattern.permute.xlu0 %v1366_v37  ;;  %v755_v37 = vld [vmem:[%s1718_s2 + $0xe0] sm:$0xff] }
  0x80   :  { %761 = vperm.xlu0 %1312, %v727_v40  }
  0x82   :  { %781 = vperm.xlu1 %1313, %v731_v0  }
  0x84   :  { %786 = vperm.xlu0 %1312, %v732_v41  }
  0x86   :  { %791 = vperm.xlu1 %1313, %v733_v42  }
  0x88   :  { %796 = vperm.xlu0 %1312, %v734_v43  }
  0x8a   :  { %801 = vperm.xlu1 %1313, %v735_v44   ;;  %v757_v44 = vld [vmem:[%s1718_s2 + $0xf0] sm:$0xff] }
  0x8c   :  { %806 = vperm.xlu0 %1312, %v736_v45   ;;  %v758_v45 = vld [vmem:[%s1718_s2 + $0xf8] sm:$0xff]  ;;  %s1367_s2 = smov [#allocation6]  }
  0x8d   :  { %s988_s11 = sshll.u32 %s1367_s2, 4  ;;  %s989_s11 = int_to_ptr.vmem [resolvable:$true] %s988_s11 }
  0x8e   :  { %811 = vperm.xlu1 %1313, %v737_v46   ;;  %s1336_s12 = scalar_lea.vmem %s989_s11, 4096  ;;  %p1341_p9 = scmp.lt.s32.totalorder %s989_s11, %s989_s11 }
  0x8f   :  { %p1337_p8 = scmp.ne.s32.totalorder %s989_s11, %s1336_s12  ;;  %p1342_p10 = scmp.lt.s32.totalorder %s1336_s12, %s1336_s12 }
  0x90   :  { %816 = vperm.xlu0 %1312, %v738_v47  }
  0x91   :  { %p1343_p11 = por %p1342_p10, %p1341_p9 }
  0x92   :  { %821 = vperm.xlu1 %1313, %v739_v48  }
  0x93   :  { %p1344_p12 = pnand %p1343_p11, %p1337_p8 }
  0x94   :  { %826 = vperm.xlu0 %1312, %v740_v49  }
  0x96   :  { %831 = vperm.xlu1 %1313, %v741_v50  }
  0x98   :  { %836 = vperm.xlu0 %1312, %v742_v51  }
  0x9a   :  { %v1120_v54 = vpop.trf.xlu0  ;;  %841 = vperm.xlu1 %1313, %v743_v52  }
  0x9b   :  { %v1232_v55 = vpop.trf.xlu1  ;;  %v1121_v56 = vunpack.i.l.bf16 %v1120_v54  ;;  %v1124_v57 = vunpack.i.h.bf16 %v1120_v54 }
  0x9c   :  { %v1233_v58 = vunpack.i.l.bf16 %v1232_v55  ;;  %v1236_v59 = vunpack.i.h.bf16 %v1232_v55  ;;  %846 = vperm.xlu0 %1312, %v744_v53  }
  0x9d   :  { %467 = vmatprep.mubr.f32.mxu0 %v1121_v56  ;;  %547 = vmatprep.mubr.f32.mxu1 %v1124_v57 }
  0x9e   :  { %v1125_v62 = vpop.trf.xlu0  ;;  %468 = vmatmul.mubr.f32.vlgmr.msra.gmra.mrb[0].mxu0 %v1233_v58  ;;  %548 = vmatmul.mubr.f32.vlgmr.msra.gmra.mrb[0].mxu1 %v1236_v59 }
  0x9f   :  { %v1237_v63 = vpop.trf.xlu1  ;;  %v1126_v1 = vunpack.i.l.bf16 %v1125_v62  ;;  %v1129_v2 = vunpack.i.h.bf16 %v1125_v62  ;;  %851 = vperm.xlu1 %1313, %v745_v60  }
  0xa0   :  { %v1238_v3 = vunpack.i.l.bf16 %v1237_v63  ;;  %v1241_v4 = vunpack.i.h.bf16 %v1237_v63  ;;  %856 = vperm.xlu0 %1312, %v746_v61  }
  0xa1   :  { %472 = vmatprep.mubr.f32.mxu0 %v1126_v1  ;;  %552 = vmatprep.mubr.f32.mxu1 %v1129_v2 }
  0xa2   :  { %v1130_v7 = vpop.trf.xlu0  ;;  %473 = vmatmul.mubr.f32.gmra.mrb[2].mxu0 %v1238_v3  ;;  %553 = vmatmul.mubr.f32.gmra.mrb[2].mxu1 %v1241_v4 }
  0xa3   :  { %v1242_v8 = vpop.trf.xlu1  ;;  %v1131_v9 = vunpack.i.l.bf16 %v1130_v7  ;;  %v1134_v10 = vunpack.i.h.bf16 %v1130_v7  ;;  %861 = vperm.xlu1 %1313, %v747_v5  }
  0xa4   :  { %v1243_v11 = vunpack.i.l.bf16 %v1242_v8  ;;  %v1246_v12 = vunpack.i.h.bf16 %v1242_v8  ;;  %866 = vperm.xlu0 %1312, %v748_v6  }
  0xa5   :  { %477 = vmatprep.mubr.f32.mxu0 %v1131_v9  ;;  %557 = vmatprep.mubr.f32.mxu1 %v1134_v10 }
  0xa6   :  { %v1135_v15 = vpop.trf.xlu0  ;;  %478 = vmatmul.mubr.f32.gmra.mrb[4].mxu0 %v1243_v11  ;;  %558 = vmatmul.mubr.f32.gmra.mrb[4].mxu1 %v1246_v12 }
  0xa7   :  { %v1247_v16 = vpop.trf.xlu1  ;;  %v1136_v17 = vunpack.i.l.bf16 %v1135_v15  ;;  %v1139_v18 = vunpack.i.h.bf16 %v1135_v15  ;;  %871 = vperm.xlu1 %1313, %v749_v13  }
  0xa8   :  { %v1248_v19 = vunpack.i.l.bf16 %v1247_v16  ;;  %v1251_v20 = vunpack.i.h.bf16 %v1247_v16  ;;  %876 = vperm.xlu0 %1312, %v750_v14  }
  0xa9   :  { %482 = vmatprep.mubr.f32.mxu0 %v1136_v17  ;;  %562 = vmatprep.mubr.f32.mxu1 %v1139_v18 }
  0xaa   :  { %v1140_v23 = vpop.trf.xlu0  ;;  %483 = vmatmul.mubr.f32.gmra.mrb[6].mxu0 %v1248_v19  ;;  %563 = vmatmul.mubr.f32.gmra.mrb[6].mxu1 %v1251_v20 }
  0xab   :  { %v1252_v24 = vpop.trf.xlu1  ;;  %v1141_v25 = vunpack.i.l.bf16 %v1140_v23  ;;  %v1144_v26 = vunpack.i.h.bf16 %v1140_v23  ;;  %881 = vperm.xlu1 %1313, %v751_v21  }
  0xac   :  { %v1253_v27 = vunpack.i.l.bf16 %v1252_v24  ;;  %v1256_v28 = vunpack.i.h.bf16 %v1252_v24  ;;  %886 = vperm.xlu0 %1312, %v752_v22  }
  0xad   :  { %487 = vmatprep.mubr.f32.mxu0 %v1141_v25  ;;  %567 = vmatprep.mubr.f32.mxu1 %v1144_v26 }
  0xae   :  { %v1145_v31 = vpop.trf.xlu0  ;;  %488 = vmatmul.mubr.f32.gmra.mrb[8].mxu0 %v1253_v27  ;;  %568 = vmatmul.mubr.f32.gmra.mrb[8].mxu1 %v1256_v28 }
  0xaf   :  { %v1257_v32 = vpop.trf.xlu1  ;;  %v1146_v33 = vunpack.i.l.bf16 %v1145_v31  ;;  %v1149_v34 = vunpack.i.h.bf16 %v1145_v31  ;;  %891 = vperm.xlu1 %1313, %v753_v29  }
  0xb0   :  { %v1258_v35 = vunpack.i.l.bf16 %v1257_v32  ;;  %v1261_v36 = vunpack.i.h.bf16 %v1257_v32  ;;  %896 = vperm.xlu0 %1312, %v754_v30  }
  0xb1   :  { %492 = vmatprep.mubr.f32.mxu0 %v1146_v33  ;;  %572 = vmatprep.mubr.f32.mxu1 %v1149_v34 }
  0xb2   :  { %v1150_v39 = vpop.trf.xlu0  ;;  %493 = vmatmul.mubr.f32.gmra.mrb[10].mxu0 %v1258_v35  ;;  %573 = vmatmul.mubr.f32.gmra.mrb[10].mxu1 %v1261_v36 }
  0xb3   :  { %v1262_v40 = vpop.trf.xlu1  ;;  %v1151_v0 = vunpack.i.l.bf16 %v1150_v39  ;;  %v1154_v41 = vunpack.i.h.bf16 %v1150_v39  ;;  %901 = vperm.xlu1 %1313, %v755_v37  }
  0xb4   :  { %v1263_v42 = vunpack.i.l.bf16 %v1262_v40  ;;  %v1266_v43 = vunpack.i.h.bf16 %v1262_v40  ;;  %906 = vperm.xlu0 %1312, %v756_v38  }
  0xb5   :  { %497 = vmatprep.mubr.f32.mxu0 %v1151_v0  ;;  %577 = vmatprep.mubr.f32.mxu1 %v1154_v41 }
  0xb6   :  { %v1155_v46 = vpop.trf.xlu0  ;;  %498 = vmatmul.mubr.f32.gmra.mrb[12].mxu0 %v1263_v42  ;;  %578 = vmatmul.mubr.f32.gmra.mrb[12].mxu1 %v1266_v43 }
  0xb7   :  { %v1267_v47 = vpop.trf.xlu1  ;;  %v1156_v48 = vunpack.i.l.bf16 %v1155_v46  ;;  %v1159_v49 = vunpack.i.h.bf16 %v1155_v46  ;;  %911 = vperm.xlu1 %1313, %v757_v44  }
  0xb8   :  { %v1268_v50 = vunpack.i.l.bf16 %v1267_v47  ;;  %v1271_v51 = vunpack.i.h.bf16 %v1267_v47  ;;  %916 = vperm.xlu0 %1312, %v758_v45  }
  0xb9   :  { %502 = vmatprep.mubr.f32.mxu0 %v1156_v48  ;;  %582 = vmatprep.mubr.f32.mxu1 %v1159_v49 }
  0xba   :  { %v1160_v52 = vpop.trf.xlu0  ;;  %503 = vmatmul.mubr.f32.gmra.mrb[14].mxu0 %v1268_v50  ;;  %583 = vmatmul.mubr.f32.gmra.mrb[14].mxu1 %v1271_v51 }
  0xbb   :  { %v1272_v53 = vpop.trf.xlu1  ;;  %v1161_v54 = vunpack.i.l.bf16 %v1160_v52  ;;  %v1164_v55 = vunpack.i.h.bf16 %v1160_v52 }
  0xbc   :  { %v1273_v56 = vunpack.i.l.bf16 %v1272_v53  ;;  %v1276_v57 = vunpack.i.h.bf16 %v1272_v53 }
  0xbd   :  { %507 = vmatprep.mubr.f32.mxu0 %v1161_v54  ;;  %587 = vmatprep.mubr.f32.mxu1 %v1164_v55 }
  0xbe   :  { %v1165_v58 = vpop.trf.xlu0  ;;  %508 = vmatmul.mubr.f32.gmra.mrb[16].mxu0 %v1273_v56  ;;  %588 = vmatmul.mubr.f32.gmra.mrb[16].mxu1 %v1276_v57 }
  0xbf   :  { %v1277_v59 = vpop.trf.xlu1  ;;  %v1166_v60 = vunpack.i.l.bf16 %v1165_v58  ;;  %v1169_v61 = vunpack.i.h.bf16 %v1165_v58 }
  0xc0   :  { %v1278_v62 = vunpack.i.l.bf16 %v1277_v59  ;;  %v1281_v63 = vunpack.i.h.bf16 %v1277_v59 }
  0xc1   :  { %512 = vmatprep.mubr.f32.mxu0 %v1166_v60  ;;  %592 = vmatprep.mubr.f32.mxu1 %v1169_v61 }
  0xc2   :  { %v1170_v1 = vpop.trf.xlu0  ;;  %513 = vmatmul.mubr.f32.gmra.mrb[18].mxu0 %v1278_v62  ;;  %593 = vmatmul.mubr.f32.gmra.mrb[18].mxu1 %v1281_v63 }
  0xc3   :  { %v1282_v2 = vpop.trf.xlu1  ;;  %v1171_v3 = vunpack.i.l.bf16 %v1170_v1  ;;  %v1174_v4 = vunpack.i.h.bf16 %v1170_v1 }
  0xc4   :  { %v1283_v5 = vunpack.i.l.bf16 %v1282_v2  ;;  %v1286_v6 = vunpack.i.h.bf16 %v1282_v2 }
  0xc5   :  { %517 = vmatprep.mubr.f32.mxu0 %v1171_v3  ;;  %597 = vmatprep.mubr.f32.mxu1 %v1174_v4 }
  0xc6   :  { %v1175_v7 = vpop.trf.xlu0  ;;  %518 = vmatmul.mubr.f32.gmra.mrb[20].mxu0 %v1283_v5  ;;  %598 = vmatmul.mubr.f32.gmra.mrb[20].mxu1 %v1286_v6 }
  0xc7   :  { %v1287_v8 = vpop.trf.xlu1  ;;  %v1176_v9 = vunpack.i.l.bf16 %v1175_v7  ;;  %v1179_v10 = vunpack.i.h.bf16 %v1175_v7 }
  0xc8   :  { %v1288_v11 = vunpack.i.l.bf16 %v1287_v8  ;;  %v1291_v12 = vunpack.i.h.bf16 %v1287_v8 }
  0xc9   :  { %522 = vmatprep.mubr.f32.mxu0 %v1176_v9  ;;  %602 = vmatprep.mubr.f32.mxu1 %v1179_v10 }
  0xca   :  { %v1180_v13 = vpop.trf.xlu0  ;;  %523 = vmatmul.mubr.f32.gmra.mrb[22].mxu0 %v1288_v11  ;;  %603 = vmatmul.mubr.f32.gmra.mrb[22].mxu1 %v1291_v12 }
  0xcb   :  { %v1292_v14 = vpop.trf.xlu1  ;;  %v1181_v15 = vunpack.i.l.bf16 %v1180_v13  ;;  %v1184_v16 = vunpack.i.h.bf16 %v1180_v13 }
  0xcc   :  { %v1293_v17 = vunpack.i.l.bf16 %v1292_v14  ;;  %v1296_v18 = vunpack.i.h.bf16 %v1292_v14 }
  0xcd   :  { %527 = vmatprep.mubr.f32.mxu0 %v1181_v15  ;;  %607 = vmatprep.mubr.f32.mxu1 %v1184_v16 }
  0xce   :  { %v1185_v19 = vpop.trf.xlu0  ;;  %528 = vmatmul.mubr.f32.gmra.mrb[24].mxu0 %v1293_v17  ;;  %608 = vmatmul.mubr.f32.gmra.mrb[24].mxu1 %v1296_v18 }
  0xcf   :  { %v1297_v20 = vpop.trf.xlu1  ;;  %v1186_v21 = vunpack.i.l.bf16 %v1185_v19  ;;  %v1189_v22 = vunpack.i.h.bf16 %v1185_v19 }
  0xd0   :  { %v1298_v23 = vunpack.i.l.bf16 %v1297_v20  ;;  %v1301_v24 = vunpack.i.h.bf16 %v1297_v20 }
  0xd1   :  { %532 = vmatprep.mubr.f32.mxu0 %v1186_v21  ;;  %612 = vmatprep.mubr.f32.mxu1 %v1189_v22 }
  0xd2   :  { %v1190_v25 = vpop.trf.xlu0  ;;  %533 = vmatmul.mubr.f32.gmra.mrb[26].mxu0 %v1298_v23  ;;  %613 = vmatmul.mubr.f32.gmra.mrb[26].mxu1 %v1301_v24 }
  0xd3   :  { %v1302_v26 = vpop.trf.xlu1  ;;  %v1191_v27 = vunpack.i.l.bf16 %v1190_v25  ;;  %v1194_v28 = vunpack.i.h.bf16 %v1190_v25 }
  0xd4   :  { %v1303_v29 = vunpack.i.l.bf16 %v1302_v26  ;;  %v1306_v30 = vunpack.i.h.bf16 %v1302_v26 }
  0xd5   :  { %537 = vmatprep.mubr.f32.mxu0 %v1191_v27  ;;  %617 = vmatprep.mubr.f32.mxu1 %v1194_v28 }
  0xd6   :  { %v1195_v31 = vpop.trf.xlu0  ;;  %538 = vmatmul.mubr.f32.gmra.mrb[28].mxu0 %v1303_v29  ;;  %618 = vmatmul.mubr.f32.gmra.mrb[28].mxu1 %v1306_v30 }
  0xd7   :  { %v1307_v32 = vpop.trf.xlu1  ;;  %v1196_v33 = vunpack.i.l.bf16 %v1195_v31  ;;  %v1199_v34 = vunpack.i.h.bf16 %v1195_v31 }
  0xd8   :  { %v1308_v35 = vunpack.i.l.bf16 %v1307_v32  ;;  %v1311_v36 = vunpack.i.h.bf16 %v1307_v32 }
  0xd9   :  { %542 = vmatprep.mubr.f32.mxu0 %v1196_v33  ;;  %622 = vmatprep.mubr.f32.mxu1 %v1199_v34 }
  0xda   :  { %543 = vmatmul.mubr.f32.gmra.mrb[30].mxu0 %v1308_v35  ;;  %623 = vmatmul.mubr.f32.gmra.mrb[30].mxu1 %v1311_v36 }
  0xf5   :  { %v767_v37 = vpop.permute.xlu1 %766 }
  0xf9   :  { %v772_v38 = vpop.permute.xlu1 %771 }
  0xfd   :  { %v777_v39 = vpop.permute.xlu1 %776 }
  0xff   :  { %v762_v40 = vpop.permute.xlu0 %761 }
 0x101   :  { %v782_v0 = vpop.permute.xlu1 %781 }
 0x103   :  { %v787_v41 = vpop.permute.xlu0 %786 }
 0x105   :  { %v1674_v42 = vpop.permute.xlu1 %791 }
 0x107   :  { %v1676_v43 = vpop.permute.xlu0 %796 }
 0x109   :  { %v1678_v44 = vpop.permute.xlu1 %801 }
 0x10b   :  { %v1680_v45 = vpop.permute.xlu0 %806 }
 0x10d   :  { %v1682_v46 = vpop.permute.xlu1 %811 }
 0x10f   :  { %v1684_v47 = vpop.permute.xlu0 %816 }
 0x111   :  { %v1686_v48 = vpop.permute.xlu1 %821 }
 0x113   :  { %v1688_v49 = vpop.permute.xlu0 %826 }
 0x115   :  { %v1690_v50 = vpop.permute.xlu1 %831 }
 0x117   :  { %v1692_v51 = vpop.permute.xlu0 %836 }
 0x119   :  { %v842_v52 = vpop.permute.xlu1 %841 }
 0x11b   :  { %v847_v59 = vpop.permute.xlu0 %846 }
 0x11e   :  { %v852_v3 = vpop.permute.xlu1 %851 }
 0x11f   :  { %v857_v10 = vpop.permute.xlu0 %856 }
 0x122   :  { %v862_v17 = vpop.permute.xlu1 %861 }
 0x123   :  { %v867_v24 = vpop.permute.xlu0 %866 }
 0x126   :  { %v872_v31 = vpop.permute.xlu1 %871 }
 0x171   :  { %v469_v53 = vpop.f32.mrb[0].mxu0  ;;  %v549_v54 = vpop.f32.mrb[0].mxu1 }
 0x172   :  { %v919_v55 = vmul.f32 %v762_v40, %v469_v53  ;;  %v935_v56 = vmul.f32 %v842_v52, %v549_v54  ;;  %v471_v57 = vpop.f32.mrb[1].mxu0  ;;  %v551_v58 = vpop.f32.mrb[1].mxu1 }
 0x173   :  { %v882_v54 = vpop.permute.xlu1 %881 }
 0x174   :  { %951 = vst [vmem:[#allocation6] sm:$0xff] %v919_v55  ;;  %967 = vst [vmem:[#allocation6 + $0x80] sm:$0xff] %v935_v56 }
 0x175   :  { %v474_v60 = vpop.f32.mrb[2].mxu0  ;;  %v554_v61 = vpop.f32.mrb[2].mxu1 }
 0x176   :  { %v920_v62 = vmul.f32 %v767_v37, %v474_v60  ;;  %v936_v63 = vmul.f32 %v847_v59, %v554_v61  ;;  %v476_v1 = vpop.f32.mrb[3].mxu0  ;;  %v556_v2 = vpop.f32.mrb[3].mxu1 }
 0x178   :  { %952 = vst [vmem:[#allocation6 + $0x8] sm:$0xff] %v920_v62  ;;  %968 = vst [vmem:[#allocation6 + $0x88] sm:$0xff] %v936_v63 }
 0x179   :  { %v479_v4 = vpop.f32.mrb[4].mxu0  ;;  %v559_v5 = vpop.f32.mrb[4].mxu1 }
 0x17a   :  { %v921_v6 = vmul.f32 %v772_v38, %v479_v4  ;;  %v937_v7 = vmul.f32 %v852_v3, %v559_v5  ;;  %v481_v8 = vpop.f32.mrb[5].mxu0  ;;  %v561_v9 = vpop.f32.mrb[5].mxu1 }
 0x17b   :  { %v877_v38 = vpop.permute.xlu0 %876  ;;  %v892_v3 = vpop.permute.xlu1 %891 }
 0x17c   :  { %953 = vst [vmem:[#allocation6 + $0x10] sm:$0xff] %v921_v6  ;;  %969 = vst [vmem:[#allocation6 + $0x90] sm:$0xff] %v937_v7 }
 0x17d   :  { %v484_v11 = vpop.f32.mrb[6].mxu0  ;;  %v564_v12 = vpop.f32.mrb[6].mxu1 }
 0x17e   :  { %v922_v13 = vmul.f32 %v777_v39, %v484_v11  ;;  %v938_v14 = vmul.f32 %v857_v10, %v564_v12  ;;  %v486_v15 = vpop.f32.mrb[7].mxu0  ;;  %v566_v16 = vpop.f32.mrb[7].mxu1 }
 0x17f   :  { %v887_v60 = vpop.permute.xlu0 %886  ;;  %v902_v15 = vpop.permute.xlu1 %901 }
 0x180   :  { %954 = vst [vmem:[#allocation6 + $0x18] sm:$0xff] %v922_v13  ;;  %970 = vst [vmem:[#allocation6 + $0x98] sm:$0xff] %v938_v14 }
 0x181   :  { %v489_v18 = vpop.f32.mrb[8].mxu0  ;;  %v569_v19 = vpop.f32.mrb[8].mxu1 }
 0x182   :  { %v923_v20 = vmul.f32 %v782_v0, %v489_v18  ;;  %v939_v21 = vmul.f32 %v862_v17, %v569_v19  ;;  %v491_v22 = vpop.f32.mrb[9].mxu0  ;;  %v571_v23 = vpop.f32.mrb[9].mxu1 }
 0x183   :  { %v897_v9 = vpop.permute.xlu0 %896 }
 0x184   :  { %955 = vst [vmem:[#allocation6 + $0x20] sm:$0xff] %v923_v20  ;;  %971 = vst [vmem:[#allocation6 + $0xa0] sm:$0xff] %v939_v21 }
 0x185   :  { %v494_v25 = vpop.f32.mrb[10].mxu0  ;;  %v574_v26 = vpop.f32.mrb[10].mxu1 }
 0x186   :  { %v924_v27 = vmul.f32 %v787_v41, %v494_v25  ;;  %v940_v28 = vmul.f32 %v867_v24, %v574_v26  ;;  %v496_v29 = vpop.f32.mrb[11].mxu0  ;;  %v576_v30 = vpop.f32.mrb[11].mxu1 }
 0x187   :  { %v907_v21 = vpop.permute.xlu0 %906 }
 0x188   :  { %956 = vst [vmem:[#allocation6 + $0x28] sm:$0xff] %v924_v27  ;;  %972 = vst [vmem:[#allocation6 + $0xa8] sm:$0xff] %v940_v28  ;;  %v912_v27 = vpop.permute.xlu1 %911 }
 0x189   :  { %v499_v32 = vpop.f32.mrb[12].mxu0  ;;  %v579_v33 = vpop.f32.mrb[12].mxu1 }
 0x18a   :  { %v925_v34 = vmul.f32 %v1674_v42, %v499_v32  ;;  %v941_v35 = vmul.f32 %v872_v31, %v579_v33  ;;  %v501_v36 = vpop.f32.mrb[13].mxu0  ;;  %v581_v37 = vpop.f32.mrb[13].mxu1 }
 0x18b   :  { %v917_v33 = vpop.permute.xlu0 %916 }
 0x18c   :  { %957 = vst [vmem:[#allocation6 + $0x30] sm:$0xff] %v925_v34  ;;  %973 = vst [vmem:[#allocation6 + $0xb0] sm:$0xff] %v941_v35 }
 0x18d   :  { %v504_v39 = vpop.f32.mrb[14].mxu0  ;;  %v584_v40 = vpop.f32.mrb[14].mxu1 }
 0x18e   :  { %v926_v0 = vmul.f32 %v1676_v43, %v504_v39  ;;  %v942_v41 = vmul.f32 %v877_v38, %v584_v40  ;;  %v506_v52 = vpop.f32.mrb[15].mxu0  ;;  %v586_v53 = vpop.f32.mrb[15].mxu1 }
 0x190   :  { %958 = vst [vmem:[#allocation6 + $0x38] sm:$0xff] %v926_v0  ;;  %974 = vst [vmem:[#allocation6 + $0xb8] sm:$0xff] %v942_v41 }
 0x191   :  { %v509_v55 = vpop.f32.mrb[16].mxu0  ;;  %v589_v56 = vpop.f32.mrb[16].mxu1 }
 0x192   :  { %v927_v42 = vmul.f32 %v1678_v44, %v509_v55  ;;  %v943_v57 = vmul.f32 %v882_v54, %v589_v56  ;;  %v511_v58 = vpop.f32.mrb[17].mxu0  ;;  %v591_v59 = vpop.f32.mrb[17].mxu1 }
 0x194   :  { %959 = vst [vmem:[#allocation6 + $0x40] sm:$0xff] %v927_v42  ;;  %975 = vst [vmem:[#allocation6 + $0xc0] sm:$0xff] %v943_v57 }
 0x195   :  { %v514_v61 = vpop.f32.mrb[18].mxu0  ;;  %v594_v62 = vpop.f32.mrb[18].mxu1 }
 0x196   :  { %v928_v43 = vmul.f32 %v1680_v45, %v514_v61  ;;  %v944_v63 = vmul.f32 %v887_v60, %v594_v62  ;;  %v516_v1 = vpop.f32.mrb[19].mxu0  ;;  %v596_v2 = vpop.f32.mrb[19].mxu1 }
 0x198   :  { %960 = vst [vmem:[#allocation6 + $0x48] sm:$0xff] %v928_v43  ;;  %976 = vst [vmem:[#allocation6 + $0xc8] sm:$0xff] %v944_v63 }
 0x199   :  { %v519_v4 = vpop.f32.mrb[20].mxu0  ;;  %v599_v5 = vpop.f32.mrb[20].mxu1 }
 0x19a   :  { %v929_v44 = vmul.f32 %v1682_v46, %v519_v4  ;;  %v945_v6 = vmul.f32 %v892_v3, %v599_v5  ;;  %v521_v7 = vpop.f32.mrb[21].mxu0  ;;  %v601_v8 = vpop.f32.mrb[21].mxu1 }
 0x19c   :  { %961 = vst [vmem:[#allocation6 + $0x50] sm:$0xff] %v929_v44  ;;  %977 = vst [vmem:[#allocation6 + $0xd0] sm:$0xff] %v945_v6 }
 0x19d   :  { %v524_v10 = vpop.f32.mrb[22].mxu0  ;;  %v604_v11 = vpop.f32.mrb[22].mxu1 }
 0x19e   :  { %v930_v45 = vmul.f32 %v1684_v47, %v524_v10  ;;  %v946_v12 = vmul.f32 %v897_v9, %v604_v11  ;;  %v526_v13 = vpop.f32.mrb[23].mxu0  ;;  %v606_v14 = vpop.f32.mrb[23].mxu1 }
 0x1a0   :  { %962 = vst [vmem:[#allocation6 + $0x58] sm:$0xff] %v930_v45  ;;  %978 = vst [vmem:[#allocation6 + $0xd8] sm:$0xff] %v946_v12 }
 0x1a1   :  { %v529_v16 = vpop.f32.mrb[24].mxu0  ;;  %v609_v17 = vpop.f32.mrb[24].mxu1 }
 0x1a2   :  { %v931_v46 = vmul.f32 %v1686_v48, %v529_v16  ;;  %v947_v18 = vmul.f32 %v902_v15, %v609_v17  ;;  %v531_v19 = vpop.f32.mrb[25].mxu0  ;;  %v611_v20 = vpop.f32.mrb[25].mxu1 }
 0x1a4   :  { %963 = vst [vmem:[#allocation6 + $0x60] sm:$0xff] %v931_v46  ;;  %979 = vst [vmem:[#allocation6 + $0xe0] sm:$0xff] %v947_v18 }
 0x1a5   :  { %v534_v22 = vpop.f32.mrb[26].mxu0  ;;  %v614_v23 = vpop.f32.mrb[26].mxu1 }
 0x1a6   :  { %v932_v47 = vmul.f32 %v1688_v49, %v534_v22  ;;  %v948_v24 = vmul.f32 %v907_v21, %v614_v23  ;;  %v536_v25 = vpop.f32.mrb[27].mxu0  ;;  %v616_v26 = vpop.f32.mrb[27].mxu1 }
 0x1a8   :  { %964 = vst [vmem:[#allocation6 + $0x68] sm:$0xff] %v932_v47  ;;  %980 = vst [vmem:[#allocation6 + $0xe8] sm:$0xff] %v948_v24 }
 0x1a9   :  { %v539_v28 = vpop.f32.mrb[28].mxu0  ;;  %v619_v29 = vpop.f32.mrb[28].mxu1 }
 0x1aa   :  { %v933_v48 = vmul.f32 %v1690_v50, %v539_v28  ;;  %v949_v30 = vmul.f32 %v912_v27, %v619_v29  ;;  %v541_v31 = vpop.f32.mrb[29].mxu0  ;;  %v621_v32 = vpop.f32.mrb[29].mxu1 }
 0x1ac   :  { %965 = vst [vmem:[#allocation6 + $0x70] sm:$0xff] %v933_v48  ;;  %981 = vst [vmem:[#allocation6 + $0xf0] sm:$0xff] %v949_v30 }
 0x1ad   :  { %v544_v34 = vpop.f32.mrb[30].mxu0  ;;  %v624_v49 = vpop.f32.mrb[30].mxu1 }
 0x1ae   :  { %v934_v35 = vmul.f32 %v1692_v51, %v544_v34  ;;  %v950_v36 = vmul.f32 %v917_v33, %v624_v49  ;;  %v546_v37 = vpop.f32.mrb[31].mxu0  ;;  %v626_v38 = vpop.f32.mrb[31].mxu1 }
 0x1b0   :  { %966 = vst [vmem:[#allocation6 + $0x78] sm:$0xff] %v934_v35  ;;  %982 = vst [vmem:[#allocation6 + $0xf8] sm:$0xff] %v950_v36 }
 0x1b1   :  { %1347 = shalt.err (!%p1344_p12)
}
 0x1b2   :  { %s1348_s15 = scalar_lea.hbm %s1719_s3, 4096 }
 0x1b3   :  { %p1349_p13 = scmp.ne.s32.totalorder %s1719_s3, %s1348_s15  ;;  %p1352_p0 = scmp.lt.u32.totalorder %s1348_s15, %s1719_s3 }
 0x1b5   :  { %p1354_p1 = pnand %p1352_p0, %p1349_p13 }
 0x1b7   :  { %1357 = shalt.err (!%p1354_p1)
}
 0x1b8   :  { %s1368_s20 = smov 128   ;;  %s1369_s21 = smov 8  }
 0x1b9   :  { %994 = dma.vmem_to_hbm [thread:$0]  %s989_s11, 4096, %s1719_s3, [#allocation5], %s1368_s20, %s1368_s20, %s1369_s21  }
 0x1ba   :  { %1360 = dma.done.wait [#allocation5], 4096  }
 0x1bb   :  { %1361 = vsyncadd [#allocation5], 4294963200 }
 0x1bc   :  { %998 = vsyncpa [#allocation4], 1 }
 0x1bd   :  { %999 = vsyncpa [#allocation5], 1 }

</bundles_post_ra>
